<compile_context>
chip_gen: v7x
topology: tpu7x:2x2x1
jax: 0.10.0
libtpu: 0.0.40
codegen_flags: <defaults>
</compile_context>

<pallas_src>
import functools

import jax
import jax.numpy as jnp
from jax.experimental import pallas as pl
from jax.experimental.pallas import tpu as pltpu

LANE = 128


def _classifier_kernel(x_ref, mask_ref, w1_ref, b1_ref, w2_ref, b2_ref,
                       out_ref, xstk_ref, acc_ref, *,
                       wp, inv_hw, tile_px, cin, num_classes):
    t = pl.program_id(1)
    n_groups = tile_px // LANE

    @pl.when(t == 0)
    def _init():
        acc_ref[...] = jnp.zeros_like(acc_ref)

    # Stacked conv operand: nine shifted [cin, tile_px] tap windows of the
    # halo'd per-tile input window, assembled ONCE into VMEM scratch
    # [9*cin, tile_px] via static slices (the lane shift lives here, not in
    # front of nine separate live matmuls).
    for kh in range(3):
        for kw in range(3):
            tap = kh * 3 + kw
            off = kh * wp + kw                           # static tap offset
            xstk_ref[tap * cin:(tap + 1) * cin, :] = x_ref[0, 0, :, off:off + tile_px]

    # Single fused MXU dot (bf16 x bf16 -> f32), contraction over 9*cin.
    h = jnp.dot(w1_ref[...], xstk_ref[...], preferred_element_type=jnp.float32)
    h = jnp.maximum(h + b1_ref[...], 0.0)                # bias + ReLU, f32 [cmid, tile_px]

    # Masked global-average-pool partial sums, lane-dense: only aligned
    # vreg-group adds per tile; the 128->1 cross-lane reduce is deferred.
    hm = h * mask_ref[t]                                 # mask kills pad/halo pixels
    part = hm[:, 0:LANE]
    for g in range(1, n_groups):
        part = part + hm[:, g * LANE:(g + 1) * LANE]
    acc_ref[...] += part                                 # [cmid, 128] f32

    @pl.when(t == pl.num_programs(1) - 1)
    def _finalize():
        pooled = jnp.sum(acc_ref[...], axis=-1, keepdims=True) * inv_hw      # [cmid, 1]
        # FC head: tiny -> VPU multiply + sublane reduce (lane-dense row out).
        logits = jnp.sum(pooled * w2_ref[...], axis=0, keepdims=True) + b2_ref[...]

        lane = jax.lax.broadcasted_iota(jnp.int32, logits.shape, 1)
        is_cls = lane < num_classes
        zm = jnp.where(is_cls, logits, jnp.float32(-1e30))   # mask padded classes
        m = jnp.max(zm, axis=-1, keepdims=True)
        z = zm - m
        e = jnp.exp(z)
        s = jnp.sum(e, axis=-1, keepdims=True)
        # Exact softmax / log-softmax, kept mutually consistent (once / image).
        p = e / s
        logp = z - jnp.log(s)
        ent = -jnp.sum(jnp.where(is_cls, p * logp, 0.0), axis=-1, keepdims=True)

        # Lane-dense output row: logits in lanes [0, C), entropy in lane C.
        row = jnp.where(is_cls, logits, jnp.where(lane == num_classes, ent, 0.0))
        out_ref[...] = row.reshape(out_ref.shape)


def generic_classifier_forward(x, params, *, tile_px=None):
    """x: NCHW float32.  Returns (logits [N, num_classes], entropy [N])."""
    w1, b1, w2, b2 = params
    n, cin, h, w = x.shape
    cmid = w1.shape[0]
    num_classes = w2.shape[1]
    assert num_classes < LANE                       # spare lane for the entropy value
    hp, wp = h + 2, w + 2

    # --- Tile selection: cap from vreg pressure (identical on v5e/v6e/v7x):
    # keep the live f32 activation cmid x tile_px around <= 96 KiB.  When the
    # whole padded image fits under the cap, n_tiles collapses to 1.
    px_all = pl.cdiv(hp * wp, LANE) * LANE
    cap = max(LANE, ((96 * 1024) // (4 * cmid)) // LANE * LANE)
    if tile_px is None:
        tile_px = min(px_all, cap)
    tile_px = max(LANE, (tile_px // LANE) * LANE)
    halo = pl.cdiv(2 * wp + 2, LANE) * LANE         # covers the max 3x3 tap offset
    n_tiles = pl.cdiv(hp * wp, tile_px)
    win_len = tile_px + halo                        # per-tile window incl. halo
    flat_len = n_tiles * tile_px + halo

    # --- Host-side layout plumbing (no 9x im2col blow-up): zero-pad spatially,
    # flatten pixels onto lanes, cut per-tile windows with the halo baked in.
    xp = jnp.pad(x, ((0, 0), (0, 0), (1, 1), (1, 1)))
    flat = jnp.pad(xp.reshape(n, cin, hp * wp),
                   ((0, 0), (0, 0), (0, flat_len - hp * wp)))
    windows = jnp.stack([flat[:, :, t * tile_px: t * tile_px + win_len]
                         for t in range(n_tiles)], axis=1).astype(jnp.bfloat16)

    # Pool-validity mask over the padded output grid (constant BlockSpec index
    # -> DMA'd once and kept resident, not re-fetched every grid step).
    pix = jnp.arange(n_tiles * tile_px, dtype=jnp.int32)
    valid = ((pix % wp) < w) & ((pix // wp) < h)
    mask = valid.astype(jnp.float32).reshape(n_tiles, 1, tile_px)

    # Kernel-layout parameters (tap-major conv weight == stacked-operand order).
    w1k = jnp.transpose(w1, (0, 2, 3, 1)).reshape(cmid, 9 * cin).astype(jnp.bfloat16)
    b1k = b1.reshape(cmid, 1).astype(jnp.float32)
    w2k = jnp.pad(w2, ((0, 0), (0, LANE - num_classes))).astype(jnp.float32)
    b2k = jnp.pad(b2.reshape(1, num_classes),
                  ((0, 0), (0, LANE - num_classes))).astype(jnp.float32)

    kernel = functools.partial(
        _classifier_kernel, wp=wp, inv_hw=1.0 / float(h * w),
        tile_px=tile_px, cin=cin, num_classes=num_classes)

    out = pl.pallas_call(
        kernel,
        out_shape=jax.ShapeDtypeStruct((n, 1, LANE), jnp.float32),
        grid=(n, n_tiles),
        in_specs=[
            # Per-(image, tile) input window, halo baked in.
            pl.BlockSpec((1, 1, cin, win_len), lambda i, t: (i, t, 0, 0)),
            # Resident pool mask (constant index -> fetched once).
            pl.BlockSpec((n_tiles, 1, tile_px), lambda i, t: (0, 0, 0)),
            # Parameters (constant index -> fetched once).
            # TODO(synk): for a large real stem, add pipeline_mode=pl.Buffered(1)
            # to avoid double-buffering the weight blocks.
            pl.BlockSpec((cmid, 9 * cin), lambda i, t: (0, 0)),
            pl.BlockSpec((cmid, 1), lambda i, t: (0, 0)),
            pl.BlockSpec((cmid, LANE), lambda i, t: (0, 0)),
            pl.BlockSpec((1, LANE), lambda i, t: (0, 0)),
        ],
        out_specs=pl.BlockSpec((1, 1, LANE), lambda i, t: (i, 0, 0)),
        scratch_shapes=[
            pltpu.VMEM((9 * cin, tile_px), jnp.bfloat16),   # stacked conv operand
            pltpu.VMEM((cmid, LANE), jnp.float32),          # lane-dense pool accumulator
        ],
        compiler_params=pltpu.CompilerParams(
            dimension_semantics=("parallel", "arbitrary"),
            # Actual footprint << 1 MiB; 32 MiB gives headroom over v5e's 16 MiB
            # default scoped VMEM and stays well under v7x's 64 MiB/TC.
            vmem_limit_bytes=32 * 1024 * 1024),
    )(windows, mask, w1k, b1k, w2k, b2k)

    logits = out[:, 0, :num_classes]
    entropy = out[:, 0, num_classes]
    return logits, entropy


def init_params(key, cin=4, cmid=32, num_classes=10):
    k1, k2, k3, k4 = jax.random.split(key, 4)
    w1 = jax.random.normal(k1, (cmid, cin, 3, 3), jnp.float32) * 0.1   # OIHW conv
    b1 = jax.random.normal(k2, (cmid,), jnp.float32) * 0.01
    w2 = jax.random.normal(k3, (cmid, num_classes), jnp.float32) * 0.1
    b2 = jax.random.normal(k4, (num_classes,), jnp.float32) * 0.01
    return w1, b1, w2, b2


def _reference_forward(x, params):
    """Plain-JAX reference mirroring the kernel's bf16 input/weight rounding."""
    w1, b1, w2, b2 = params
    xb = x.astype(jnp.bfloat16).astype(jnp.float32)
    w1b = w1.astype(jnp.bfloat16).astype(jnp.float32)
    y = jax.lax.conv_general_dilated(
        xb, w1b, window_strides=(1, 1), padding=((1, 1), (1, 1)),
        dimension_numbers=("NCHW", "OIHW", "NCHW"),
        precision=jax.lax.Precision.HIGHEST)
    y = jnp.maximum(y + b1[None, :, None, None], 0.0)
    pooled = jnp.mean(y, axis=(2, 3))
    logits = jnp.dot(pooled, w2, precision=jax.lax.Precision.HIGHEST) + b2
    p = jax.nn.softmax(logits, axis=-1)
    ent = -jnp.sum(p * jnp.log(p), axis=-1)
    return logits, ent


if __name__ == "__main__":
    key = jax.random.PRNGKey(0)
    kx, kp = jax.random.split(key)
    N, CIN, H, W = 2, 4, 16, 16
    CMID, NUM_CLASSES = 32, 10
    x = jax.random.normal(kx, (N, CIN, H, W), jnp.float32)             # NCHW
    params = init_params(kp, cin=CIN, cmid=CMID, num_classes=NUM_CLASSES)

    ref_logits, ref_ent = _reference_forward(x, params)

    # Recommended configuration: auto tile -> the whole padded 16x16 image fits
    # in one grid step per image (n_tiles == 1).
    logits, entropy = generic_classifier_forward(x, params)
    jax.block_until_ready((logits, entropy))
    assert jnp.allclose(logits, ref_logits, atol=2e-3), "logits mismatch (n_tiles=1)"
    assert jnp.allclose(entropy, ref_ent, atol=5e-3), "entropy mismatch (n_tiles=1)"

    # Forced 128-pixel tiles (3 tiles/image): exercises the running-sum
    # accumulator path of the same kernel.
    logits2, entropy2 = generic_classifier_forward(x, params, tile_px=128)
    jax.block_until_ready((logits2, entropy2))
    assert jnp.allclose(logits2, ref_logits, atol=2e-3), "logits mismatch (tiled)"
    assert jnp.allclose(entropy2, ref_ent, atol=5e-3), "entropy mismatch (tiled)"

    print("KERNEL_OK")
</pallas_src>

<mosaic_0001>
module attributes {stable_mosaic.version = 11 : i64} {
  func.func @_classifier_kernel(%arg0: i32, %arg1: i32, %arg2: memref<1x1x4x512xbf16, #tpu.memory_space<vmem>>, %arg3: memref<1x1x384xf32, #tpu.memory_space<vmem>>, %arg4: memref<32x36xbf16, #tpu.memory_space<vmem>>, %arg5: memref<32x1xf32, #tpu.memory_space<vmem>>, %arg6: memref<32x128xf32, #tpu.memory_space<vmem>>, %arg7: memref<1x128xf32, #tpu.memory_space<vmem>>, %arg8: memref<1x1x128xf32, #tpu.memory_space<vmem>>, %arg9: memref<36x384xbf16, #tpu.memory_space<vmem>>, %arg10: memref<32x128xf32, #tpu.memory_space<vmem>>) attributes {dimension_semantics = [#tpu.dimension_semantics<parallel>, #tpu.dimension_semantics<arbitrary>], iteration_bounds = array<i64: 2, 1>, scalar_prefetch = 0 : i64, scratch_operands = 2 : i64, tpu.core_type = #tpu.core_type<tc>, window_params = [{transform_indices = @transform_0, window_bounds = array<i64: 1, 1, 4, 512>}, {pipeline_mode = #tpu.pipeline_mode<synchronous>, transform_indices = @transform_1, window_bounds = array<i64: 1, 1, 384>}, {pipeline_mode = #tpu.pipeline_mode<synchronous>, transform_indices = @transform_2, window_bounds = array<i64: 32, 36>}, {pipeline_mode = #tpu.pipeline_mode<synchronous>, transform_indices = @transform_3, window_bounds = array<i64: 32, 1>}, {pipeline_mode = #tpu.pipeline_mode<synchronous>, transform_indices = @transform_4, window_bounds = array<i64: 32, 128>}, {pipeline_mode = #tpu.pipeline_mode<synchronous>, transform_indices = @transform_5, window_bounds = array<i64: 1, 128>}, {transform_indices = @transform_6, window_bounds = array<i64: 1, 1, 128>}]} {
    %c0_i32 = arith.constant 0 : i32
    %0 = arith.cmpi eq, %arg1, %c0_i32 : i32
    %1 = arith.extui %0 : i1 to i32
    %c0_i32_0 = arith.constant 0 : i32
    %2 = arith.cmpi ne, %1, %c0_i32_0 : i32
    scf.if %2 {
      %cst_54 = arith.constant 0.000000e+00 : f32
      %54 = vector.broadcast %cst_54 : f32 to vector<32x128xf32>
      %c0_55 = arith.constant 0 : index
      %c0_56 = arith.constant 0 : index
      %55 = vector.load %arg10[%c0_55, %c0_56] : memref<32x128xf32, #tpu.memory_space<vmem>>, vector<32x128xf32>
      tpu.vector_store %arg10[%c0_55, %c0_56], %54 {strides = array<i32>} : memref<32x128xf32, #tpu.memory_space<vmem>>, vector<32x128xf32>,
    } else {
    }
    %c0 = arith.constant 0 : index
    %c0_1 = arith.constant 0 : index
    %c0_2 = arith.constant 0 : index
    %c0_3 = arith.constant 0 : index
    %3 = vector.load %arg2[%c0, %c0_1, %c0_2, %c0_3] : memref<1x1x4x512xbf16, #tpu.memory_space<vmem>>, vector<1x1x4x384xbf16>
    %4 = vector.shape_cast %3 : vector<1x1x4x384xbf16> to vector<4x384xbf16>
    %c0_4 = arith.constant 0 : index
    %c0_5 = arith.constant 0 : index
    %5 = vector.load %arg9[%c0_4, %c0_5] : memref<36x384xbf16, #tpu.memory_space<vmem>>, vector<4x384xbf16>
    tpu.vector_store %arg9[%c0_4, %c0_5], %4 {strides = array<i32>} : memref<36x384xbf16, #tpu.memory_space<vmem>>, vector<4x384xbf16>,
    %c0_6 = arith.constant 0 : index
    %c0_7 = arith.constant 0 : index
    %c0_8 = arith.constant 0 : index
    %c1 = arith.constant 1 : index
    %6 = vector.load %arg2[%c0_6, %c0_7, %c0_8, %c1] : memref<1x1x4x512xbf16, #tpu.memory_space<vmem>>, vector<1x1x4x384xbf16>
    %7 = vector.shape_cast %6 : vector<1x1x4x384xbf16> to vector<4x384xbf16>
    %c4 = arith.constant 4 : index
    %c0_9 = arith.constant 0 : index
    %8 = vector.load %arg9[%c4, %c0_9] : memref<36x384xbf16, #tpu.memory_space<vmem>>, vector<4x384xbf16>
    tpu.vector_store %arg9[%c4, %c0_9], %7 {strides = array<i32>} : memref<36x384xbf16, #tpu.memory_space<vmem>>, vector<4x384xbf16>,
    %c0_10 = arith.constant 0 : index
    %c0_11 = arith.constant 0 : index
    %c0_12 = arith.constant 0 : index
    %c2 = arith.constant 2 : index
    %9 = vector.load %arg2[%c0_10, %c0_11, %c0_12, %c2] : memref<1x1x4x512xbf16, #tpu.memory_space<vmem>>, vector<1x1x4x384xbf16>
    %10 = vector.shape_cast %9 : vector<1x1x4x384xbf16> to vector<4x384xbf16>
    %c8 = arith.constant 8 : index
    %c0_13 = arith.constant 0 : index
    %11 = vector.load %arg9[%c8, %c0_13] : memref<36x384xbf16, #tpu.memory_space<vmem>>, vector<4x384xbf16>
    tpu.vector_store %arg9[%c8, %c0_13], %10 {strides = array<i32>} : memref<36x384xbf16, #tpu.memory_space<vmem>>, vector<4x384xbf16>,
    %c0_14 = arith.constant 0 : index
    %c0_15 = arith.constant 0 : index
    %c0_16 = arith.constant 0 : index
    %c18 = arith.constant 18 : index
    %12 = vector.load %arg2[%c0_14, %c0_15, %c0_16, %c18] : memref<1x1x4x512xbf16, #tpu.memory_space<vmem>>, vector<1x1x4x384xbf16>
    %13 = vector.shape_cast %12 : vector<1x1x4x384xbf16> to vector<4x384xbf16>
    %c12 = arith.constant 12 : index
    %c0_17 = arith.constant 0 : index
    %14 = vector.load %arg9[%c12, %c0_17] : memref<36x384xbf16, #tpu.memory_space<vmem>>, vector<4x384xbf16>
    tpu.vector_store %arg9[%c12, %c0_17], %13 {strides = array<i32>} : memref<36x384xbf16, #tpu.memory_space<vmem>>, vector<4x384xbf16>,
    %c0_18 = arith.constant 0 : index
    %c0_19 = arith.constant 0 : index
    %c0_20 = arith.constant 0 : index
    %c19 = arith.constant 19 : index
    %15 = vector.load %arg2[%c0_18, %c0_19, %c0_20, %c19] : memref<1x1x4x512xbf16, #tpu.memory_space<vmem>>, vector<1x1x4x384xbf16>
    %16 = vector.shape_cast %15 : vector<1x1x4x384xbf16> to vector<4x384xbf16>
    %c16 = arith.constant 16 : index
    %c0_21 = arith.constant 0 : index
    %17 = vector.load %arg9[%c16, %c0_21] : memref<36x384xbf16, #tpu.memory_space<vmem>>, vector<4x384xbf16>
    tpu.vector_store %arg9[%c16, %c0_21], %16 {strides = array<i32>} : memref<36x384xbf16, #tpu.memory_space<vmem>>, vector<4x384xbf16>,
    %c0_22 = arith.constant 0 : index
    %c0_23 = arith.constant 0 : index
    %c0_24 = arith.constant 0 : index
    %c20 = arith.constant 20 : index
    %18 = vector.load %arg2[%c0_22, %c0_23, %c0_24, %c20] : memref<1x1x4x512xbf16, #tpu.memory_space<vmem>>, vector<1x1x4x384xbf16>
    %19 = vector.shape_cast %18 : vector<1x1x4x384xbf16> to vector<4x384xbf16>
    %c20_25 = arith.constant 20 : index
    %c0_26 = arith.constant 0 : index
    %20 = vector.load %arg9[%c20_25, %c0_26] : memref<36x384xbf16, #tpu.memory_space<vmem>>, vector<4x384xbf16>
    tpu.vector_store %arg9[%c20_25, %c0_26], %19 {strides = array<i32>} : memref<36x384xbf16, #tpu.memory_space<vmem>>, vector<4x384xbf16>,
    %c0_27 = arith.constant 0 : index
    %c0_28 = arith.constant 0 : index
    %c0_29 = arith.constant 0 : index
    %c36 = arith.constant 36 : index
    %21 = vector.load %arg2[%c0_27, %c0_28, %c0_29, %c36] : memref<1x1x4x512xbf16, #tpu.memory_space<vmem>>, vector<1x1x4x384xbf16>
    %22 = vector.shape_cast %21 : vector<1x1x4x384xbf16> to vector<4x384xbf16>
    %c24 = arith.constant 24 : index
    %c0_30 = arith.constant 0 : index
    %23 = vector.load %arg9[%c24, %c0_30] : memref<36x384xbf16, #tpu.memory_space<vmem>>, vector<4x384xbf16>
    tpu.vector_store %arg9[%c24, %c0_30], %22 {strides = array<i32>} : memref<36x384xbf16, #tpu.memory_space<vmem>>, vector<4x384xbf16>,
    %c0_31 = arith.constant 0 : index
    %c0_32 = arith.constant 0 : index
    %c0_33 = arith.constant 0 : index
    %c37 = arith.constant 37 : index
    %24 = vector.load %arg2[%c0_31, %c0_32, %c0_33, %c37] : memref<1x1x4x512xbf16, #tpu.memory_space<vmem>>, vector<1x1x4x384xbf16>
    %25 = vector.shape_cast %24 : vector<1x1x4x384xbf16> to vector<4x384xbf16>
    %c28 = arith.constant 28 : index
    %c0_34 = arith.constant 0 : index
    %26 = vector.load %arg9[%c28, %c0_34] : memref<36x384xbf16, #tpu.memory_space<vmem>>, vector<4x384xbf16>
    tpu.vector_store %arg9[%c28, %c0_34], %25 {strides = array<i32>} : memref<36x384xbf16, #tpu.memory_space<vmem>>, vector<4x384xbf16>,
    %c0_35 = arith.constant 0 : index
    %c0_36 = arith.constant 0 : index
    %c0_37 = arith.constant 0 : index
    %c38 = arith.constant 38 : index
    %27 = vector.load %arg2[%c0_35, %c0_36, %c0_37, %c38] : memref<1x1x4x512xbf16, #tpu.memory_space<vmem>>, vector<1x1x4x384xbf16>
    %28 = vector.shape_cast %27 : vector<1x1x4x384xbf16> to vector<4x384xbf16>
    %c32 = arith.constant 32 : index
    %c0_38 = arith.constant 0 : index
    %29 = vector.load %arg9[%c32, %c0_38] : memref<36x384xbf16, #tpu.memory_space<vmem>>, vector<4x384xbf16>
    tpu.vector_store %arg9[%c32, %c0_38], %28 {strides = array<i32>} : memref<36x384xbf16, #tpu.memory_space<vmem>>, vector<4x384xbf16>,
    %c0_39 = arith.constant 0 : index
    %c0_40 = arith.constant 0 : index
    %30 = vector.load %arg4[%c0_39, %c0_40] : memref<32x36xbf16, #tpu.memory_space<vmem>>, vector<32x36xbf16>
    %c0_41 = arith.constant 0 : index
    %c0_42 = arith.constant 0 : index
    %31 = vector.load %arg9[%c0_41, %c0_42] : memref<36x384xbf16, #tpu.memory_space<vmem>>, vector<36x384xbf16>
    %cst = arith.constant dense<0.000000e+00> : vector<32x384xf32>
    %32 = tpu.matmul %30, %31, %cst {dimension_numbers = #tpu.dot_dimension_numbers<[1], [0], [0], [1], [0, 0, 1, 1], [], []>} : vector<32x36xbf16>, vector<36x384xbf16>, vector<32x384xf32> -> vector<32x384xf32>
    %c0_43 = arith.constant 0 : index
    %c0_44 = arith.constant 0 : index
    %33 = vector.load %arg5[%c0_43, %c0_44] : memref<32x1xf32, #tpu.memory_space<vmem>>, vector<32x1xf32>
    %34 = vector.broadcast %33 : vector<32x1xf32> to vector<32x384xf32>
    %35 = arith.addf %32, %34 : vector<32x384xf32>
    %cst_45 = arith.constant 0.000000e+00 : f32
    %36 = vector.broadcast %cst_45 : f32 to vector<32x384xf32>
    %37 = arith.maximumf %35, %36 : vector<32x384xf32>
    %38 = arith.index_cast %arg1 : i32 to index
    %c0_46 = arith.constant 0 : index
    %c0_47 = arith.constant 0 : index
    %39 = vector.load %arg3[%38, %c0_46, %c0_47] : memref<1x1x384xf32, #tpu.memory_space<vmem>>, vector<1x1x384xf32>
    %40 = vector.shape_cast %39 : vector<1x1x384xf32> to vector<1x384xf32>
    %41 = vector.broadcast %40 : vector<1x384xf32> to vector<32x384xf32>
    %42 = arith.mulf %37, %41 : vector<32x384xf32>
    %43 = vector.extract_strided_slice %42 {offsets = [0, 0], sizes = [32, 128], strides = [1, 1]} : vector<32x384xf32> to vector<32x128xf32>
    %44 = vector.extract_strided_slice %42 {offsets = [0, 128], sizes = [32, 128], strides = [1, 1]} : vector<32x384xf32> to vector<32x128xf32>
    %45 = arith.addf %43, %44 : vector<32x128xf32>
    %46 = vector.extract_strided_slice %42 {offsets = [0, 256], sizes = [32, 128], strides = [1, 1]} : vector<32x384xf32> to vector<32x128xf32>
    %47 = arith.addf %45, %46 : vector<32x128xf32>
    %c0_48 = arith.constant 0 : index
    %c0_49 = arith.constant 0 : index
    %48 = vector.load %arg10[%c0_48, %c0_49] : memref<32x128xf32, #tpu.memory_space<vmem>>, vector<32x128xf32>
    %49 = arith.addf %48, %47 : vector<32x128xf32>
    %c0_50 = arith.constant 0 : index
    %c0_51 = arith.constant 0 : index
    %50 = vector.load %arg10[%c0_50, %c0_51] : memref<32x128xf32, #tpu.memory_space<vmem>>, vector<32x128xf32>
    tpu.vector_store %arg10[%c0_50, %c0_51], %49 {strides = array<i32>} : memref<32x128xf32, #tpu.memory_space<vmem>>, vector<32x128xf32>,
    %c0_i32_52 = arith.constant 0 : i32
    %51 = arith.cmpi eq, %arg1, %c0_i32_52 : i32
    %52 = arith.extui %51 : i1 to i32
    %c0_i32_53 = arith.constant 0 : i32
    %53 = arith.cmpi ne, %52, %c0_i32_53 : i32
    scf.if %53 {
      %c0_54 = arith.constant 0 : index
      %c0_55 = arith.constant 0 : index
      %54 = vector.load %arg10[%c0_54, %c0_55] : memref<32x128xf32, #tpu.memory_space<vmem>>, vector<32x128xf32>
      %cst_56 = arith.constant dense<0.000000e+00> : vector<32xf32>
      %55 = vector.multi_reduction <add>, %54, %cst_56 [1] : vector<32x128xf32> to vector<32xf32>
      %56 = vector.shape_cast %55 : vector<32xf32> to vector<32x1xf32>
      %cst_57 = arith.constant 3.906250e-03 : f32
      %57 = vector.broadcast %cst_57 : f32 to vector<32x1xf32>
      %58 = arith.mulf %56, %57 : vector<32x1xf32>
      %c0_58 = arith.constant 0 : index
      %c0_59 = arith.constant 0 : index
      %59 = vector.load %arg6[%c0_58, %c0_59] : memref<32x128xf32, #tpu.memory_space<vmem>>, vector<32x128xf32>
      %60 = vector.broadcast %58 : vector<32x1xf32> to vector<32x128xf32>
      %61 = arith.mulf %60, %59 : vector<32x128xf32>
      %cst_60 = arith.constant dense<0.000000e+00> : vector<128xf32>
      %62 = vector.multi_reduction <add>, %61, %cst_60 [0] : vector<32x128xf32> to vector<128xf32>
      %63 = vector.shape_cast %62 : vector<128xf32> to vector<1x128xf32>
      %c0_61 = arith.constant 0 : index
      %c0_62 = arith.constant 0 : index
      %64 = vector.load %arg7[%c0_61, %c0_62] : memref<1x128xf32, #tpu.memory_space<vmem>>, vector<1x128xf32>
      %65 = arith.addf %63, %64 : vector<1x128xf32>
      %66 = tpu.iota {dimensions = array<i32: 1>} : vector<1x128xi32>
      %c10_i32 = arith.constant 10 : i32
      %67 = vector.broadcast %c10_i32 : i32 to vector<1x128xi32>
      %68 = arith.cmpi slt, %66, %67 : vector<1x128xi32>
      %cst_63 = arith.constant -1.000000e+30 : f32
      %69 = vector.broadcast %cst_63 : f32 to vector<1x128xf32>
      %70 = arith.select %68, %65, %69 : vector<1x128xi1>, vector<1x128xf32>
      %cst_64 = arith.constant dense<0xFF800000> : vector<1xf32>
      %71 = vector.multi_reduction <maximumf>, %70, %cst_64 [1] : vector<1x128xf32> to vector<1xf32>
      %72 = vector.shape_cast %71 : vector<1xf32> to vector<1x1xf32>
      %73 = vector.broadcast %72 : vector<1x1xf32> to vector<1x128xf32>
      %74 = arith.subf %70, %73 : vector<1x128xf32>
      %75 = math.exp %74 : vector<1x128xf32>
      %cst_65 = arith.constant dense<0.000000e+00> : vector<1xf32>
      %76 = vector.multi_reduction <add>, %75, %cst_65 [1] : vector<1x128xf32> to vector<1xf32>
      %77 = vector.shape_cast %76 : vector<1xf32> to vector<1x1xf32>
      %78 = vector.broadcast %77 : vector<1x1xf32> to vector<1x128xf32>
      %79 = arith.divf %75, %78 : vector<1x128xf32>
      %80 = math.log %77 : vector<1x1xf32>
      %81 = vector.broadcast %80 : vector<1x1xf32> to vector<1x128xf32>
      %82 = arith.subf %74, %81 : vector<1x128xf32>
      %83 = arith.mulf %79, %82 : vector<1x128xf32>
      %cst_66 = arith.constant 0.000000e+00 : f32
      %84 = vector.broadcast %cst_66 : f32 to vector<1x128xf32>
      %85 = arith.select %68, %83, %84 : vector<1x128xi1>, vector<1x128xf32>
      %cst_67 = arith.constant dense<0.000000e+00> : vector<1xf32>
      %86 = vector.multi_reduction <add>, %85, %cst_67 [1] : vector<1x128xf32> to vector<1xf32>
      %87 = vector.shape_cast %86 : vector<1xf32> to vector<1x1xf32>
      %cst_68 = arith.constant 0.000000e+00 : f32
      %88 = vector.broadcast %cst_68 : f32 to vector<1x1xf32>
      %89 = arith.subf %88, %87 : vector<1x1xf32>
      %c10_i32_69 = arith.constant 10 : i32
      %90 = vector.broadcast %c10_i32_69 : i32 to vector<1x128xi32>
      %91 = arith.cmpi eq, %66, %90 : vector<1x128xi32>
      %cst_70 = arith.constant 0.000000e+00 : f32
      %92 = vector.shape_cast %89 : vector<1x1xf32> to vector<1x1xf32>
      %93 = vector.broadcast %92 : vector<1x1xf32> to vector<1x128xf32>
      %94 = vector.broadcast %cst_70 : f32 to vector<1x128xf32>
      %95 = arith.select %91, %93, %94 : vector<1x128xi1>, vector<1x128xf32>
      %96 = arith.select %68, %65, %95 : vector<1x128xi1>, vector<1x128xf32>
      %97 = vector.shape_cast %96 : vector<1x128xf32> to vector<1x1x128xf32>
      %c0_71 = arith.constant 0 : index
      %c0_72 = arith.constant 0 : index
      %c0_73 = arith.constant 0 : index
      %98 = vector.load %arg8[%c0_71, %c0_72, %c0_73] : memref<1x1x128xf32, #tpu.memory_space<vmem>>, vector<1x1x128xf32>
      tpu.vector_store %arg8[%c0_71, %c0_72, %c0_73], %97 {strides = array<i32>} : memref<1x1x128xf32, #tpu.memory_space<vmem>>, vector<1x1x128xf32>,
    } else {
    }
    return
  }
  func.func @transform_0(%arg0: i32, %arg1: i32) -> (i32, i32, i32, i32) {
    %c0_i32 = arith.constant 0 : i32
    %c0_i32_0 = arith.constant 0 : i32
    %c0_i32_1 = arith.constant 0 : i32
    return %arg0, %arg1, %c0_i32, %c0_i32_0 : i32, i32, i32, i32
  }
  func.func @transform_1(%arg0: i32, %arg1: i32) -> (i32, i32, i32) {
    %c0_i32 = arith.constant 0 : i32
    %c0_i32_0 = arith.constant 0 : i32
    %c0_i32_1 = arith.constant 0 : i32
    %c0_i32_2 = arith.constant 0 : i32
    return %c0_i32, %c0_i32_0, %c0_i32_1 : i32, i32, i32
  }
  func.func @transform_2(%arg0: i32, %arg1: i32) -> (i32, i32) {
    %c0_i32 = arith.constant 0 : i32
    %c0_i32_0 = arith.constant 0 : i32
    %c0_i32_1 = arith.constant 0 : i32
    return %c0_i32, %c0_i32_0 : i32, i32
  }
  func.func @transform_3(%arg0: i32, %arg1: i32) -> (i32, i32) {
    %c0_i32 = arith.constant 0 : i32
    %c0_i32_0 = arith.constant 0 : i32
    %c0_i32_1 = arith.constant 0 : i32
    return %c0_i32, %c0_i32_0 : i32, i32
  }
  func.func @transform_4(%arg0: i32, %arg1: i32) -> (i32, i32) {
    %c0_i32 = arith.constant 0 : i32
    %c0_i32_0 = arith.constant 0 : i32
    %c0_i32_1 = arith.constant 0 : i32
    return %c0_i32, %c0_i32_0 : i32, i32
  }
  func.func @transform_5(%arg0: i32, %arg1: i32) -> (i32, i32) {
    %c0_i32 = arith.constant 0 : i32
    %c0_i32_0 = arith.constant 0 : i32
    %c0_i32_1 = arith.constant 0 : i32
    return %c0_i32, %c0_i32_0 : i32, i32
  }
  func.func @transform_6(%arg0: i32, %arg1: i32) -> (i32, i32, i32) {
    %c0_i32 = arith.constant 0 : i32
    %c0_i32_0 = arith.constant 0 : i32
    %c0_i32_1 = arith.constant 0 : i32
    return %arg0, %c0_i32, %c0_i32_0 : i32, i32, i32
  }
}

</mosaic_0001>

<bundles_post_ra>
// kernel: tpu_custom_call.1
= control target key start
LH: loop header
LB: loop body
LE: loop exit
PB: predicated region body
PF: predicated region fallthrough
CT: control target
= control target key end

     0   :  { %11 = vsyncpa [#allocation5], 0  ;;  %s1635_s0 = inlined_call_operand.vmem [shape: bf16[2,1,4,512], index: 0, kind: input, shape index: {}]   ;;  %s1636_s1 = inlined_call_operand.hbm [shape: f32[1,1,384], index: 1, kind: input, shape index: {}]   ;;  %s1637_s2 = inlined_call_operand.hbm [shape: bf16[32,36], index: 2, kind: input, shape index: {}]   ;;  %s1638_s3 = inlined_call_operand.vmem [shape: f32[32,1], index: 3, kind: input, shape index: {}]   ;;  %s1639_s4 = inlined_call_operand.vmem [shape: f32[32,128], index: 4, kind: input, shape index: {}]   ;;  %s1640_s5 = inlined_call_operand.vmem [shape: f32[1,128], index: 5, kind: input, shape index: {}]   ;;  %s1641_s6 = inlined_call_operand.hbm [shape: f32[2,1,128], index: 6, kind: output, shape index: {}]  }
   0x1   :  { %12 = vsyncpa [#allocation8], 0 }
   0x2   :  { %13 = vsyncpa [#allocation6], 0 }
   0x3   :  { %15 = vsyncpa [#allocation6 + $0x1], 0  ;;  %s1383_s21 = smov 0   ;;  %s1385_s22 = smov 0  }
   0x4   :  { %s1387_s23 = smov 0   ;;  %s1389_s24 = smov 0  }
   0x5   :  { %s1391_s25 = smov 0   ;;  %s1393_s26 = smov 0  }
   0x6 LB: > { %s1028_s27 = sadd.s32 4294967295, %s1331_s26   ;;  %s1029_s28 = sadd.s32 4294967294, %s1331_s26   ;;  %s1331_s26 = sphi %s1393_s26, %s21_s26   ;;  %s1327_s25 = sphi %s1391_s25, %s1659_s25   ;;  %s1323_s24 = sphi %s1389_s24, %s1658_s24   ;;  %s1319_s23 = sphi %s1387_s23, %s1657_s23   ;;  %s1315_s22 = sphi %s1385_s22, %s1656_s22   ;;  %s1311_s21 = sphi %s1383_s21, %s1655_s21  }
   0x7   : > { %s33_s29 = sadd.s32 1, %s1327_s25  ;;  %s173_s30 = sadd.s32 1, %s1319_s23 }
   0x8   : > { %p35_p0 = scmp.ge.s32.totalorder %s33_s29, 2  ;;  %p183_p1 = scmp.ne.s32.totalorder %s1319_s23, %s1315_s22 }
   0x9   : > { %p184_p2 = scmp.eq.s32.totalorder %s1028_s27, 1  ;;  %p189_p3 = scmp.ne.s32.totalorder %s1315_s22, %s1311_s21 }
   0xa   : > { %s1661_s29 = smov (%p35_p0, %s33_s29), 0  ;;  %p190_p5 = scmp.eq.s32.totalorder %s1029_s28, 1 }
   0xb   : > { %p1423_p4 = por %p184_p2, %p183_p1  ;;  %s170_s8 = ssub.s32 %s1327_s25, %s1661_s29 }
   0xc   : > { %p1030_p6 = scmp.ge.s32.totalorder %s1331_s26, 1  ;;  %p171_p7 = scmp.eq.s32.totalorder %s170_s8, 0 }
   0xd   : > { %s1646_s7 = scalar_select %p1423_p4, 1, 0 }
   0xe   : > { %p1430_p8 = por %p190_p5, %p189_p3  ;;  %p197_p9 = scmp.lt.s32.totalorder %s1331_s26, 3 }
   0xf   : > { %s1436_s10 = scalar_select %p171_p7, %s1319_s23, %s173_s30  }
  0x10   : > { %s1647_s9 = scalar_select %p1430_p8, 1, 0 }
  0x11   : > { %p1438_p10 = pnand %p1030_p6, %p197_p9  ;;  %p1442_p11 = scmp.eq.s32.totalorder %s1028_s27, 0 }
  0x12   : > { %s1333_s13 = smov [#allocation4]   ;;  %s1334_s15 = smov [#allocation7]  }
  0x13   : > { %s1648_s11 = scalar_select %p1438_p10, 1, 0 }
  0x14   : > { %s1649_s12 = scalar_select %p1442_p11, 1, 0 }
  0x15   : > { %p1087_p12 = pneg %p1438_p10  ;;  %s210_s14 = sshll.u32 %s1333_s13, 4  ;;  %s211_s14 = int_to_ptr.vmem [resolvable:$true] %s210_s14 }
  0x16   : > { %s220_s16 = sshll.u32 %s1334_s15, 4  ;;  %s1189_s20 = scalar_lea.hbm %s1636_s1, 48  ;;  %s1454_s16 = int_to_ptr.vmem [resolvable:$true] %s220_s16 }
  0x17   : > { %p1450_p13 = pnand %p1442_p11, %p1087_p12  ;;  %p1190_p0 = scmp.ne.s32.totalorder %s1636_s1, %s1189_s20 }
  0x18   : > { %p1196_p5 = scmp.lt.u32.totalorder %s1189_s20, %s1636_s1 }
  0x19   : > { %p1191_p1 = pneg %p1450_p13 }
  0x1b   : > { %p1192_p2 = pnand %p1191_p1, %p1190_p0 }
  0x1d   : > { %p1193_p3 = pneg %p1192_p2 }
  0x1f   : > { %p1198_p6 = pnand %p1196_p5, %p1193_p3 }
  0x21   : > { %1201 = shalt.err (!%p1198_p6)
}
  0x22   : > { %s1202_s13 = scalar_lea.vmem %s211_s14, 48  ;;  %s1209_s15 = scalar_lea.vmem %s211_s14, 64 }
  0x23   : > { %p1203_p7 = scmp.ne.s32.totalorder %s211_s14, %s1202_s13  ;;  %p1210_p8 = scmp.lt.s32.totalorder %s211_s14, %s211_s14 }
  0x24   : > { %p1211_p4 = scmp.lt.s32.totalorder %s1209_s15, %s1202_s13 }
  0x25   : > { %p1205_p9 = pnand %p1203_p7, %p1191_p1 }
  0x26   : > { %p1212_p11 = por %p1211_p4, %p1210_p8 }
  0x27   : > { %p1206_p12 = pneg %p1205_p9 }
  0x29   : > { %p1213_p10 = pnand %p1212_p11, %p1206_p12 }
  0x2b   : > { %1216 = shalt.err (!%p1213_p10)
}
  0x2c   : > { %1090 = dma.hbm_to_vmem [thread:$0]  (!%p1450_p13), %s1636_s1, 48, %s211_s14, [#allocation5]  }
  0x2d   : > { %s1217_s28 = scalar_lea.hbm %s1637_s2, 256 }
  0x2e   : > { %p1218_p0 = scmp.ne.s32.totalorder %s1637_s2, %s1217_s28  ;;  %p1224_p10 = scmp.lt.u32.totalorder %s1217_s28, %s1637_s2 }
  0x30   : > { %p1220_p4 = pnand %p1218_p0, %p1191_p1 }
  0x32   : > { %p1221_p8 = pneg %p1220_p4 }
  0x34   : > { %p1226_p11 = pnand %p1224_p10, %p1221_p8 }
  0x36   : > { %1229 = shalt.err (!%p1226_p11)
}
  0x37   : > { %s1230_s14 = scalar_lea.vmem %s1454_s16, 256  ;;  %p1238_p6 = scmp.lt.s32.totalorder %s1454_s16, %s1454_s16 }
  0x38   : > { %p1231_p2 = scmp.ne.s32.totalorder %s1454_s16, %s1230_s14  ;;  %p1239_p7 = scmp.lt.s32.totalorder %s1230_s14, %s1230_s14 }
  0x3a   : > { %p1233_p3 = pnand %p1231_p2, %p1191_p1  ;;  %p1240_p9 = por %p1239_p7, %p1238_p6 }
  0x3c   : > { %p1234_p5 = pneg %p1233_p3 }
  0x3e   : > { %p1241_p12 = pnand %p1240_p9, %p1234_p5 }
  0x40   : > { %1244 = shalt.err (!%p1241_p12)
}
  0x41   : > { %s1335_s18 = smov 64   ;;  %s1336_s19 = smov 4  }
  0x42   : > { %1093 = dma.hbm_to_vmem [thread:$0]  (!%p1450_p13), %s1637_s2, 256, %s1454_s16, [#allocation8], %s1335_s18, %s1335_s18, %s1336_s19  }
  0x43   : > { %p1651_p0 = scmp.ne.s32.totalorder %s1648_s11, 0 }
  0x44   : > { %p1652_p1 = scmp.ne.s32.totalorder (!%p1651_p0), %s1649_s12, 0 }
  0x45   : > { %257 = sbr.rel (%p1651_p0) target bundleno = 1126 (0x466), region = 44 }
  0x4c   : > { %1298 = dma.done.wait (%p1652_p1), [#allocation5], 48  }
  0x4d   : > { %1300 = vsyncadd (%p1652_p1), [#allocation5], 4294967248 }
  0x4e   : > { %1302 = dma.done.wait (%p1652_p1), [#allocation8], 256  }
  0x4f   : > { %1304 = vsyncadd (%p1652_p1), [#allocation8], 4294967040  ;;  %p294_p4 = scmp.lt.s32.totalorder %s1323_s24, 1  ;;  %v339_v0 = vlaneseq  ;;  %v1337_v1 = vmov 1983009808   ;;  %s1338_s12 = smov 126  }
  0x50   : > { %v337_v2 = vunpack.c.l.s4 %v1337_v1  ;;  %s1339_s8 = smov 127   ;;  %s1340_s13 = smov 110   ;;  %v1522_v14 = vld [vmem:[#allocation7] sm:$0xff]   ;;  %vm670_vm0 = vcmask 293888   ;;  %v1346_v15 = vmov 0   ;;  %v597_v16 = vld [vmem:[%s1638_s3 + $0x8] sm:$0xff] }
  0x51   : > { %s295_s11 = scalar_select %p294_p4, %s1323_s24, 1  ;;  %v1516_v3 = vshrl.u32 %v339_v0, 7  ;;  %719 = vmatprep.mubr.bf16.mxu0 %v1346_v15  ;;  %1166 = vset.pattern.permute.xlu1 %v1346_v15  ;;  %v596_v17 = vld [vmem:[%s1638_s3] sm:$0xff]  ;;  %v598_v18 = vld [vmem:[%s1638_s3 + $0x10] sm:$0xff]  ;;  %v599_v19 = vld [vmem:[%s1638_s3 + $0x18] sm:$0xff]  ;;  %vm358_vm1 = vcmask 1039360  }
  0x52   : > { %v338_v4 = vunpack.c.0.s8 %v337_v2  ;;  %s1341_s15 = smov 109   ;;  %s1342_s14 = smov 108   ;;  %1072 = vmatprep.mubr.msk.bf16.mxu1 %vm670_vm0, %v1522_v14  ;;  %1165 = vset.pattern.permute.xlu0 %v1346_v15  ;;  %vm420_vm2 = vcmask 900096   ;;  %vm356_vm3 = vcmask 1043456   ;;  %vm389_vm4 = vcmask 1031168  }
  0x53   : > { %s1060_s16 = sshll.u32 %s295_s11, 3  ;;  %s1343_s18 = smov 92   ;;  %vm451_vm5 = vcmask 891904   ;;  %vm482_vm6 = vcmask 883712   ;;  %vm513_vm7 = vcmask 752640   ;;  %vm544_vm8 = vcmask 744448  }
  0x54   : > { %s302_s30 = scalar_lea.vmem %s1635_s0, %s1060_s16  ;;  %v341_v5 = vsub.s32 %v338_v4, %v1516_v3  ;;  %s1344_s19 = smov 91   ;;  %vm575_vm9 = vcmask 736256   ;;  %vm677_vm10 = vcmask 1041408   ;;  %vm894_vm12 = vcmask 1040384  }
  0x55   : > { %v365_v6 = vld [vmem:[%s302_s30] sm:$0xff]  ;;  %s1345_s20 = smov 90   ;;  %s292_s28 = sand.u32 1, %s1315_s22  }
  0x56   : > { %v312_v7 = vld [vmem:[%s302_s30] sm:$0x3f]  ;;  %v374_v8 = vrot.slane %v365_v6, %v341_v5  ;;  %v367_v10 = vcombine.high %v365_v6, %v365_v6  ;;  %v335_v11 = vcombine.low %v365_v6, %v365_v6  ;;  %s1057_s30 = sshll.u32 %s1323_s24, 4  ;;  %p1653_p8 = scmp.ne.s32.totalorder %s1646_s7, 0 }
  0x57   : > { %v314_v9 = vcombine.high %v312_v7, %v312_v7  ;;  %1039 = vst.sshfl [vmem:[#allocation2] sm:$0xf pattern:$0x76325410] %v312_v7  ;;  %s1347_s24 = smov [#allocation9]  }
  0x58   : > { %382 = vrot.lane.b32.xlu1 %v374_v8, %s1338_s12  ;;  %352 = vrot.lane.b32.xlu0 %v374_v8, %s1339_s8  ;;  %v381_v12 = vrot.slane %v367_v10, %v341_v5  ;;  %v342_v13 = vrot.slane %v335_v11, %v341_v5 }
  0x59   : > { %1040 = vst.sshfl [vmem:[#allocation2 + $0x8] sm:$0x3 pattern:$0x76325410] %v314_v9 }
  0x5c   : > { %415 = vrot.lane.b32.xlu1 %v374_v8, %s1340_s13  ;;  %444 = vrot.lane.b32.xlu0 %v374_v8, %s1341_s15 }
  0x60   : > { %384 = vrot.lane.b32.xlu1 %v381_v12, %s1338_s12  ;;  %350 = vrot.lane.b32.xlu0 %v342_v13, %s1339_s8  ;;  %s293_s12 = scalar_lea.vmem [#allocation9], %s292_s28 }
  0x61   : > { %s932_s8 = sshll.u32 %s293_s12, 4  ;;  %s1589_s8 = int_to_ptr.vmem [resolvable:$true] %s932_s8 }
  0x64   : > { %446 = vrot.lane.b32.xlu1 %v381_v12, %s1341_s15  ;;  %413 = vrot.lane.b32.xlu0 %v342_v13, %s1340_s13 }
  0x68   : > { %477 = vrot.lane.b32.xlu1 %v374_v8, %s1342_s14  ;;  %475 = vrot.lane.b32.xlu0 %v342_v13, %s1342_s14  ;;  %s1587_s14 = scalar_lea.hbm %s1641_s6, %s1057_s30 }
  0x6c   : > { %508 = vrot.lane.b32.xlu1 %v381_v12, %s1343_s18  ;;  %506 = vrot.lane.b32.xlu0 %v374_v8, %s1343_s18  ;;  %s920_s18 = scalar_lea.sflag [#allocation6], %s292_s28 }
  0x70   : > { %539 = vrot.lane.b32.xlu1 %v374_v8, %s1344_s19  ;;  %537 = vrot.lane.b32.xlu0 %v342_v13, %s1344_s19  ;;  %s1245_s19 = scalar_lea.vmem %s1589_s8, 16 }
  0x71   : > { %p1246_p13 = scmp.ne.s32.totalorder %s1589_s8, %s1245_s19 }
  0x73   : > { %p1247_p10 = pnand %p1246_p13, %p1653_p8 }
  0x74   : > { %570 = vrot.lane.b32.xlu1 %v381_v12, %s1345_s20  ;;  %568 = vrot.lane.b32.xlu0 %v374_v8, %s1345_s20  ;;  %s1249_s20 = sshll.u32 %s1347_s24, 4  ;;  %s1250_s20 = int_to_ptr.vmem [resolvable:$false] %s1249_s20 }
  0x75   : > { %p1248_p11 = pneg %p1247_p10  ;;  %s1251_s27 = scalar_lea.vmem %s1250_s20, 32 }
  0x76   : > { %p1252_p2 = scmp.lt.s32.totalorder %s1589_s8, %s1250_s20  ;;  %p1253_p3 = scmp.lt.s32.totalorder %s1251_s27, %s1245_s19 }
  0x78   : > { %607 = vperm.xlu1 %1166, %v597_v16   ;;  %602 = vperm.xlu0 %1165, %v596_v17   ;;  %p1254_p5 = por %p1253_p3, %p1252_p2 }
  0x7a   : > { %p1255_p6 = pnand %p1254_p5, %p1248_p11 }
  0x7c   : > { %612 = vperm.xlu1 %1166, %v598_v18   ;;  %617 = vperm.xlu0 %1165, %v599_v19  }
  0xca   : > { %v383_v20 = vpop.permute.xlu1 %382  ;;  %v353_v21 = vpop.permute.xlu0 %352 }
  0xcb   : > { %v355_v22 = vrot.slane %v353_v21, 4  ;;  %v386_v30 = vrot.slane %v383_v20, 4 }
  0xcd   : > { %v360_v23 = vsel %vm358_vm1, %v353_v21, %v355_v22 }
  0xce   : > { %364 = vst [vmem:[#allocation2 + $0x8] sm:$0xc] %v360_v23  ;;  %v416_v24 = vpop.permute.xlu1 %415  ;;  %v445_v25 = vpop.permute.xlu0 %444 }
  0xcf   : > { %v418_v26 = vrot.slane %v416_v24, 4  ;;  %v448_v40 = vrot.slane %v445_v25, 4 }
  0xd1   : > { %v422_v27 = vsel %vm420_vm2, %v416_v24, %v418_v26 }
  0xd2   : > { %426 = vst [vmem:[#allocation2 + $0x14] sm:$0xc] %v422_v27  ;;  %v385_v28 = vpop.permute.xlu1 %384  ;;  %v351_v29 = vpop.permute.xlu0 %350  ;;  %v1182_v27 = vld [vmem:[#allocation7 + $0x8] sm:$0xff]  }
  0xd3   : > { %v387_v31 = vrot.slane %v385_v28, 4  ;;  %v354_v32 = vrot.slane %v351_v29, 4 }
  0xd5   : > { %v388_v33 = vsel %vm356_vm3, %v386_v30, %v387_v31  ;;  %v391_v34 = vsel %vm389_vm4, %v385_v28, %v387_v31  ;;  %v357_v35 = vsel %vm356_vm3, %v354_v32, %v355_v22  ;;  %v811_v30 = vsub.s32 1, %v1516_v3  ;;  %v803_v32 = vld [vmem:[#allocation4] sm:$0x7] }
  0xd6   : > { %v390_v36 = vsel %vm389_vm4, %v383_v20, %v388_v33  ;;  %395 = vst [vmem:[#allocation2 + $0x14] sm:$0x3] %v391_v34  ;;  %v359_v37 = vsel %vm358_vm1, %v351_v29, %v357_v35  ;;  %v447_v38 = vpop.permute.xlu1 %446  ;;  %v414_v39 = vpop.permute.xlu0 %413  ;;  %v807_v29 = vsub.s32 0, %v1516_v3  ;;  %v815_v34 = vsub.s32 2, %v1516_v3 }
  0xd7   : > { %394 = vst [vmem:[#allocation2 + $0xc] sm:$0x33] %v390_v36  ;;  %363 = vst [vmem:[#allocation2] sm:$0xcc] %v359_v37  ;;  %v449_v41 = vrot.slane %v447_v38, 4  ;;  %v417_v42 = vrot.slane %v414_v39, 4 }
  0xd9   : > { %v450_v43 = vsel %vm356_vm3, %v448_v40, %v449_v41  ;;  %v453_v44 = vsel %vm451_vm5, %v447_v38, %v449_v41  ;;  %v419_v45 = vsel %vm356_vm3, %v417_v42, %v418_v26 }
  0xda   : > { %v452_v46 = vsel %vm451_vm5, %v445_v25, %v450_v43  ;;  %457 = vst [vmem:[#allocation2 + $0x20] sm:$0x3] %v453_v44  ;;  %v421_v47 = vsel %vm420_vm2, %v414_v39, %v419_v45  ;;  %v478_v48 = vpop.permute.xlu1 %477  ;;  %v476_v49 = vpop.permute.xlu0 %475 }
  0xdb   : > { %456 = vst [vmem:[#allocation2 + $0x18] sm:$0x33] %v452_v46  ;;  %425 = vst [vmem:[#allocation2 + $0xc] sm:$0xcc] %v421_v47  ;;  %v480_v50 = vrot.slane %v478_v48, 4  ;;  %v479_v51 = vrot.slane %v476_v49, 4  ;;  %v816_v46 = vrot.slane %v803_v32, %v815_v34 }
  0xdd   : > { %v484_v52 = vsel %vm482_vm6, %v478_v48, %v480_v50  ;;  %v481_v53 = vsel %vm356_vm3, %v479_v51, %v480_v50  ;;  %v1170_v54 = vld [vmem:[#allocation2 + $0x8] ss:$12 sps:$4 sm:$0xff]  }
  0xde   : > { %488 = vst [vmem:[#allocation2 + $0x20] sm:$0xc] %v484_v52  ;;  %v483_v55 = vsel %vm482_vm6, %v476_v49, %v481_v53  ;;  %v509_v56 = vpop.permute.xlu1 %508  ;;  %v507_v57 = vpop.permute.xlu0 %506  ;;  %1066 = vmatprep.subr.bf16.mxu1 %v1170_v54 }
  0xdf   : > { %487 = vst [vmem:[#allocation2 + $0x18] sm:$0xcc] %v483_v55  ;;  %v511_v58 = vrot.slane %v509_v56, 4  ;;  %v510_v59 = vrot.slane %v507_v57, 4  ;;  %1067 = vmatpush3.bf16.msra.mxu1 %v1170_v54 }
  0xe1   : > { %v515_v60 = vsel %vm513_vm7, %v509_v56, %v511_v58  ;;  %v512_v61 = vsel %vm356_vm3, %v510_v59, %v511_v58 }
  0xe2   : > { %519 = vst [vmem:[#allocation2 + $0x2c] sm:$0x3] %v515_v60  ;;  %v514_v62 = vsel %vm513_vm7, %v507_v57, %v512_v61  ;;  %v540_v63 = vpop.permute.xlu1 %539  ;;  %v538_v1 = vpop.permute.xlu0 %537  ;;  %v1171_v2 = vld [vmem:[#allocation2 + $0x4] ss:$12 sps:$4 sm:$0xff]   ;;  %v1173_v4 = vld [vmem:[#allocation2] ss:$12 sps:$4 sm:$0xff]  }
  0xe3   : > { %518 = vst [vmem:[#allocation2 + $0x24] sm:$0x33] %v514_v62  ;;  %v542_v5 = vrot.slane %v540_v63, 4  ;;  %v541_v6 = vrot.slane %v538_v1, 4  ;;  %687 = vmatprep.subr.bf16.mxu0 %v1171_v2 }
  0xe4   : > { %688 = vmatpush1.bf16.msra.mxu0 %v1173_v4 }
  0xe5   : > { %v546_v7 = vsel %vm544_vm8, %v540_v63, %v542_v5  ;;  %v543_v8 = vsel %vm356_vm3, %v541_v6, %v542_v5 }
  0xe6   : > { %550 = vst [vmem:[#allocation2 + $0x2c] sm:$0xc] %v546_v7  ;;  %v545_v9 = vsel %vm544_vm8, %v538_v1, %v543_v8  ;;  %v571_v10 = vpop.permute.xlu1 %570  ;;  %v569_v11 = vpop.permute.xlu0 %568 }
  0xe7   : > { %549 = vst [vmem:[#allocation2 + $0x24] sm:$0xcc] %v545_v9  ;;  %v573_v12 = vrot.slane %v571_v10, 4  ;;  %v572_v13 = vrot.slane %v569_v11, 4 }
  0xe9   : > { %v577_v16 = vsel %vm575_vm9, %v571_v10, %v573_v12  ;;  %v574_v17 = vsel %vm356_vm3, %v572_v13, %v573_v12 }
  0xea   : > { %581 = vst [vmem:[#allocation2 + $0x38] sm:$0x3] %v577_v16  ;;  %v576_v18 = vsel %vm575_vm9, %v569_v11, %v574_v17 }
  0xeb   : > { %580 = vst [vmem:[#allocation2 + $0x30] sm:$0x33] %v576_v18 }
  0xed   : > { %v1174_v19 = vld [vmem:[#allocation2 + $0x20] ss:$12 sps:$4 sm:$0xff]  }
  0xee   : > { %v1175_v20 = vld [vmem:[#allocation2 + $0x1c] ss:$12 sps:$4 sm:$0xff]   ;;  %v1177_v21 = vld [vmem:[#allocation2 + $0x18] ss:$12 sps:$4 sm:$0xff]   ;;  %1068 = vmatprep.subr.bf16.mxu1 %v1174_v19 }
  0xef   : > { %689 = vmatprep.subr.bf16.mxu0 %v1175_v20  ;;  %1069 = vmatpush3.bf16.msra.mxu1 %v1174_v19 }
  0xf0   : > { %690 = vmatpush1.bf16.msra.mxu0 %v1177_v21 }
  0xf1   : > { %v1178_v22 = vld [vmem:[#allocation2 + $0x38] ss:$0 sps:$4 sm:$0x33]  }
  0xf2   : > { %v594_v23 = vld [vmem:[#allocation2 + $0x30] sm:$0x33]  ;;  %1076 = vmatprep.subr.msk.bf16.mxu1 %vm677_vm10, %v1178_v22  ;;  %v685_v25 = vsel %vm677_vm10, %v1178_v22, 0 }
  0xf3   : > { %v1050_v24 = vcombine.high %v594_v23, %v594_v23  ;;  %v1049_v26 = vcombine.low %v594_v23, %v594_v23  ;;  %1071 = vmatpush3.bf16.msra.mxu1 %v685_v25 }
  0xf5   : > { %1052 = vmatprep.subr.msk.bf16.mxu0 %vm677_vm10, %v1050_v24  ;;  %v679_v28 = vsel %vm677_vm10, %v1049_v26, 0 }
  0xf6   : > { %692 = vmatpush1.bf16.msra.mxu0 %v679_v28  ;;  %1073 = vmatmul.mubr.msk.bf16.vlgmr.msra.gmra.mrb[0].mxu1 %vm670_vm0, %v1182_v27 }
  0xf7   : > { %v603_v31 = vpop.permute.xlu0 %602  ;;  %v608_v35 = vpop.permute.xlu1 %607 }
  0xf9   : > { %1053 = vmatmul.mubr.msk.bf16.vlgmr.msra.gmra.mrb[0].mxu0 %vm670_vm0, %v1522_v14  ;;  %v808_v14 = vrot.slane %v803_v32, %v807_v29 }
  0xfa   : > { %729 = vmatprep.mubr.bf16.mxu0 %v1346_v15  ;;  %v812_v15 = vrot.slane %v803_v32, %v811_v30 }
  0xfb   : > { %v613_v55 = vpop.permute.xlu1 %612  ;;  %v618_v60 = vpop.permute.xlu0 %617 }
 0x101   : > { %1054 = vmatmul.mubr.msk.bf16.gmra.mrb[4].mxu0 %vm670_vm0, %v1182_v27 }
 0x1c9   : > { %v1074_v33 = vpop.f32.mrb[0].mxu1 }
 0x1ca   : > { %v774_v36 = vpop.f32.mrb[1].mxu1  ;;  %v783_v62 = vadd.f32 %v1074_v33, %v613_v55 }
 0x1cb   : > { %v775_v38 = vadd.f32 %v774_v36, %v603_v31  ;;  %v1075_v39 = vpop.f32.mrb[2].mxu1  ;;  %v872_v36 = vld [vmem:[%s1639_s4 + $0x8] sm:$0xff] }
 0x1cc   : > { %v721_v37 = vpop.f32.mrb[0].mxu0  ;;  %v777_v42 = vpop.f32.mrb[3].mxu1  ;;  %v786_v6 = vadd.f32 %v1075_v39, %v618_v60  ;;  %v797_v16 = vmax.f32 %v783_v62, 0.0 }
 0x1cd   : > { %v722_v40 = vadd.f32 %v721_v37, %v603_v31  ;;  %v723_v41 = vpop.f32.mrb[1].mxu0  ;;  %v791_v45 = vmax.f32 %v775_v38, 0.0  ;;  %v778_v47 = vadd.f32 %v777_v42, %v608_v35  ;;  %v871_v38 = vld [vmem:[%s1639_s4] sm:$0xff]  ;;  %v874_v42 = vld [vmem:[%s1639_s4 + $0x18] sm:$0xff] }
 0x1ce   : > { %v724_v43 = vadd.f32 %v723_v41, %v603_v31  ;;  %v725_v44 = vpop.f32.mrb[2].mxu0  ;;  %v800_v22 = vmax.f32 %v786_v6, 0.0  ;;  %v828_v27 = vmul.f32 %v816_v46, %v797_v16 }
 0x1cf   : > { %v789_v48 = vmax.f32 %v722_v40, 0.0  ;;  %v726_v49 = vadd.f32 %v725_v44, %v608_v35  ;;  %v727_v50 = vpop.f32.mrb[3].mxu0  ;;  %v794_v52 = vmax.f32 %v778_v47, 0.0  ;;  %v822_v57 = vmul.f32 %v816_v46, %v791_v45  ;;  %v873_v40 = vld [vmem:[%s1639_s4 + $0x10] sm:$0xff] }
 0x1d0   : > { %v790_v51 = vmax.f32 %v724_v43, 0.0  ;;  %v728_v3 = vadd.f32 %v727_v50, %v608_v35  ;;  %v831_v30 = vmul.f32 %v816_v46, %v800_v22 }
 0x1d1   : > { %v820_v53 = vmul.f32 %v808_v14, %v789_v48  ;;  %v792_v54 = vmax.f32 %v726_v49, 0.0  ;;  %v825_v63 = vmul.f32 %v816_v46, %v794_v52 }
 0x1d2   : > { %v821_v56 = vmul.f32 %v812_v15, %v790_v51  ;;  %v793_v58 = vmax.f32 %v728_v3, 0.0 }
 0x1d3   : > { %v823_v59 = vmul.f32 %v808_v14, %v792_v54 }
 0x1d4   : > { %v824_v61 = vmul.f32 %v812_v15, %v793_v58  ;;  %v731_v1 = vpop.f32.mrb[4].mxu0  ;;  %v832_v2 = vadd.f32 %v821_v56, %v820_v53  ;;  %v891_v53 = vand.u32 127, %v339_v0 }
 0x1d5   : > { %v732_v4 = vadd.f32 %v731_v1, %v613_v55  ;;  %v733_v5 = vpop.f32.mrb[5].mxu0 }
 0x1d6   : > { %v734_v7 = vadd.f32 %v733_v5, %v613_v55  ;;  %v735_v8 = vpop.f32.mrb[6].mxu0  ;;  %v836_v9 = vadd.f32 %v832_v2, %v822_v57  ;;  %v833_v10 = vadd.f32 %v824_v61, %v823_v59  ;;  %v888_v55 = vld [vmem:[%s1640_s5] sm:$0x1]  ;;  %vm892_vm11 = vcmp.lt.s32.totalorder %v891_v53, 10 }
 0x1d7   : > { %v795_v11 = vmax.f32 %v732_v4, 0.0  ;;  %v736_v12 = vadd.f32 %v735_v8, %v618_v60  ;;  %v737_v13 = vpop.f32.mrb[7].mxu0  ;;  %vm915_vm13 = vcmp.eq.s32.totalorder %v891_v53, 10 }
 0x1d8   : > { %v796_v17 = vmax.f32 %v734_v7, 0.0  ;;  %v738_v18 = vadd.f32 %v737_v13, %v618_v60  ;;  %859 = vadd.xlane.f32.xlu1 %v836_v9  ;;  %v837_v19 = vadd.f32 %v833_v10, %v825_v63 }
 0x1d9   : > { %v826_v20 = vmul.f32 %v808_v14, %v795_v11  ;;  %v798_v21 = vmax.f32 %v736_v12, 0.0 }
 0x1da   : > { %v827_v23 = vmul.f32 %v812_v15, %v796_v17  ;;  %v799_v24 = vmax.f32 %v738_v18, 0.0  ;;  %861 = vadd.xlane.f32.xlu0 %v837_v19 }
 0x1db   : > { %v829_v25 = vmul.f32 %v808_v14, %v798_v21 }
 0x1dc   : > { %v830_v26 = vmul.f32 %v812_v15, %v799_v24  ;;  %v834_v28 = vadd.f32 %v827_v23, %v826_v20 }
 0x1de   : > { %v838_v29 = vadd.f32 %v834_v28, %v828_v27  ;;  %v835_v31 = vadd.f32 %v830_v26, %v829_v25 }
 0x1e0   : > { %863 = vadd.xlane.f32.xlu0 %v838_v29  ;;  %v839_v32 = vadd.f32 %v835_v31, %v831_v30 }
 0x1e2   : > { %865 = vadd.xlane.f32.xlu1 %v839_v32 }
 0x265   : > { %v860_v33 = vpop.xlane.xlu1 %859 }
 0x266   : > { %v867_v37 = vmul.f32 0.00390625, %v860_v33 }
 0x267   : > { %v862_v34 = vpop.xlane.xlu0 %861 }
 0x268   : > { %v868_v35 = vmul.f32 0.00390625, %v862_v34  ;;  %v875_v41 = vmul.f32 %v871_v38, %v867_v37 }
 0x26a   : > { %v876_v39 = vmul.f32 %v872_v36, %v868_v35 }
 0x26c   : > { %v879_v44 = vadd.f32 %v876_v39, %v875_v41 }
 0x26d   : > { %v864_v14 = vpop.xlane.xlu0 %863 }
 0x26e   : > { %v869_v15 = vmul.f32 0.00390625, %v864_v14 }
 0x26f   : > { %v866_v43 = vpop.xlane.xlu1 %865 }
 0x270   : > { %v877_v45 = vmul.f32 %v873_v40, %v869_v15  ;;  %v870_v46 = vmul.f32 0.00390625, %v866_v43 }
 0x272   : > { %v880_v47 = vadd.f32 %v879_v44, %v877_v45  ;;  %v878_v48 = vmul.f32 %v874_v42, %v870_v46 }
 0x274   : > { %v881_v49 = vadd.f32 %v880_v47, %v878_v48 }
 0x276   : > { %v882_v50 = vrot.slane %v881_v49, 4 }
 0x278   : > { %v883_v51 = vadd.f32 %v882_v50, %v881_v49 }
 0x27a   : > { %v884_v3 = vrot.slane %v883_v51, 2 }
 0x27c   : > { %v885_v52 = vadd.f32 %v884_v3, %v883_v51 }
 0x27e   : > { %v886_v54 = vrot.slane %v885_v52, 1 }
 0x280   : > { %v887_v56 = vadd.f32 %v886_v54, %v885_v52 }
 0x282   : > { %v889_v57 = vadd.f32 %v888_v55, %v887_v56 }
 0x284   : > { %v893_v58 = vsel %vm892_vm11, %v889_v57, -1e+30 }
 0x285   : > { %v895_v59 = vsel %vm894_vm12, %v893_v58, -inf }
 0x286   : > { %896 = vmax.xlane.f32.xlu0 %v895_v59 }
 0x313   : > { %v897_v60 = vpop.xlane.xlu0 %896 }
 0x314   : > { %v898_v61 = vsub.f32 %v893_v58, %v897_v60 }
 0x316   : > { %v899_v62 = vmul.f32 1.442695, %v898_v61 }
 0x318   : > { %1183 = vpow2.f32 %v899_v62 }
 0x322   : > { %v1184_v0 = vpop.eup %1183 }
 0x323   : > { %v901_v63 = vsel %vm894_vm12, %v1184_v0, 0.0 }
 0x324   : > { %902 = vadd.xlane.f32.xlu1 %v901_v63 }
 0x3b1   : > { %v903_v1 = vpop.xlane.xlu1 %902 }
 0x3b2   : > { %1185 = vrcp.f32 %v903_v1 }
 0x3b3   : > { %1187 = vlog2.f32 %v903_v1 }
 0x3bc   : > { %v1186_v2 = vpop.eup %1185 }
 0x3bd   : > { %v1188_v4 = vpop.eup %1187  ;;  %v905_v7 = vmul.f32 %v1186_v2, %v1184_v0 }
 0x3be   : > { %v907_v5 = vmul.f32 0.6931472, %v1188_v4 }
 0x3c0   : > { %v908_v6 = vsub.f32 %v898_v61, %v907_v5 }
 0x3c2   : > { %v909_v8 = vmul.f32 %v908_v6, %v905_v7 }
 0x3c4   : > { %v910_v9 = vsel %vm892_vm11, %v909_v8, 0.0 }
 0x3c5   : > { %v911_v10 = vsel %vm894_vm12, %v910_v9, 0.0 }
 0x3c6   : > { %912 = vadd.xlane.f32.xlu0 %v911_v10 }
 0x453   : > { %v913_v11 = vpop.xlane.xlu0 %912 }
 0x454   : > { %v914_v12 = vsub.f32 0.0, %v913_v11 }
 0x456   : > { %v916_v13 = vsel %vm915_vm13, %v914_v12, 0.0 }
 0x457   : > { %v917_v16 = vsel %vm892_vm11, %v889_v57, %v916_v13 }
 0x458   : > { %918 = vst [vmem:[%s293_s12] sm:$0x1] %v917_v16 }
 0x459   : > { %1258 = shalt.err (!%p1255_p6)
}
 0x45a   : > { %s1259_s11 = scalar_lea.hbm %s1587_s14, 16  ;;  %s1263_s28 = scalar_lea.hbm %s1641_s6, 32 }
 0x45b   : > { %p1260_p7 = scmp.ne.s32.totalorder %s1587_s14, %s1259_s11  ;;  %p1264_p0 = scmp.lt.u32.totalorder %s1587_s14, %s1641_s6 }
 0x45c   : > { %p1265_p1 = scmp.lt.u32.totalorder %s1263_s28, %s1259_s11  ;;  %p1267_p13 = scmp.lt.u32.totalorder %s1259_s11, %s1587_s14 }
 0x45d   : > { %p1261_p9 = pnand %p1260_p7, %p1653_p8 }
 0x45e   : > { %p1266_p4 = por %p1265_p1, %p1264_p0 }
 0x45f   : > { %p1262_p12 = pneg %p1261_p9 }
 0x460   : > { %p1268_p10 = por %p1267_p13, %p1266_p4 }
 0x462   : > { %p1269_p11 = pnand %p1268_p10, %p1262_p12 }
 0x464   : > { %1272 = shalt.err (!%p1269_p11)
}
 0x465   : > { %1085 = dma.vmem_to_hbm [thread:$0]  (%p1653_p8), %s1589_s8, 16, %s1587_s14, %s920_s18  }
 0x466 PF: > { %p1102_p2 = scmp.ge.s32.totalorder %s1331_s26, 2  ;;  %s944_s13 = sand.u32 1, %s1311_s21  }
 0x467   : > { %p1654_p3 = scmp.ne.s32.totalorder %s1647_s9, 0  ;;  %s945_s15 = scalar_lea.sflag [#allocation6], %s944_s13 }
 0x469   : > { %p1095_p5 = pnand %p1102_p2, %p1654_p3 }
 0x46b   : > { %1306 = dma.done.wait (!%p1095_p5), %s945_s15, 16  }
 0x46c   : > { %1308 = vsyncadd (!%p1095_p5), %s945_s15, 4294967280  ;;  %s21_s26 = sadd.s32 1, %s1331_s26   ;;  %s1655_s21 = smov %s1315_s22 }
 0x46d   : > { %p18_p6 = scmp.ge.s32.totalorder %s21_s26, 4   ;;  %s1656_s22 = smov %s1319_s23 }
 0x46e   : > { %s1657_s23 = smov %s1436_s10  ;;  %s1658_s24 = smov %s1327_s25 }
 0x46f   : > { %s1659_s25 = smov %s1661_s29  ;;  %20 = sbr.rel (!%p18_p6) target bundleno = 6 (0x6), region = 97 }
 0x476   :  { %949 = vsyncpa [#allocation5], 1 }
 0x477   :  { %951 = vsyncpa [#allocation5 + $0x1], 1 }
 0x478   :  { %952 = vsyncpa [#allocation8], 1 }
 0x479   :  { %953 = vsyncpa [#allocation6], 1 }
 0x47a   :  { %955 = vsyncpa [#allocation6 + $0x1], 1 }

</bundles_post_ra>
